<compile_context>
chip_gen: v6e
topology: v6e:2x2x1
jax: 0.10.0
libtpu: 0.0.40
codegen_flags: <defaults>
</compile_context>

<pallas_src>
import functools

import jax
import jax.numpy as jnp
from jax.experimental import pallas as pl
from jax.experimental.pallas import tpu as pltpu


def _lstm_detector_kernel(x_ref, w_ref, out_ref, *, hidden, d_in, seq_len,
                          batch_tile):
    H, D, T, BT = hidden, d_in, seq_len, batch_tile
    f32, bf16 = jnp.float32, jnp.bfloat16

    # Packed parameters (single DMA):
    #   rows [0, D)          : W_ih^T            (D, 4H)   gate order (i,f,o,g)
    #   rows [D, D+H)        : W_hh^T            (H, 4H)
    #   row  D+H             : b_ih + b_hh       (1, 4H)
    #   row  D+H+1           : [w_cls | b_cls | 0...]  (1, 4H)
    w = w_ref[...]
    wih = w[:D, :].astype(bf16)
    whh = w[D:D + H, :].astype(bf16)              # resident for the recurrence
    bias = w[D + H:D + H + 1, :]                  # (1, 4H) f32
    cls_row = w[D + H + 1:D + H + 2, :]           # (1, 4H) f32

    # Input projection for every time step in ONE MXU matmul:
    #   (T*BT, D) @ (D, 4H) + bias  ->  (T*BT, 4H), kept in vregs (no scratch).
    x2 = x_ref[...].astype(bf16)                  # (T*BT, D)
    xw = jnp.dot(x2, wih, preferred_element_type=f32) + bias

    # One full-vreg tanh per step covers sigmoid(i,f,o) and tanh(g):
    #   sigmoid(z) = 0.5 * tanh(0.5 * z) + 0.5
    lane = jax.lax.broadcasted_iota(jnp.int32, (BT, 4 * H), 1)
    is_sig = lane < 3 * H
    scale = jnp.where(is_sig, 0.5, 1.0).astype(f32)     # hoisted constants
    offset = jnp.where(is_sig, 0.5, 0.0).astype(f32)

    h = jnp.zeros((BT, H), f32)
    c = jnp.zeros((BT, H), f32)
    for t in range(T):                            # fully unrolled, static slices
        gates = xw[t * BT:(t + 1) * BT, :] + jnp.dot(
            h.astype(bf16), whh, preferred_element_type=f32)      # (BT, 4H) f32
        act = scale * jnp.tanh(scale * gates) + offset            # 1 EUP pass
        i_g = act[:, 0 * H:1 * H]
        f_g = act[:, 1 * H:2 * H]
        o_g = act[:, 2 * H:3 * H]
        g_g = act[:, 3 * H:4 * H]
        c = f_g * c + i_g * g_g
        h = o_g * jnp.tanh(c)

    # Classifier (out_features=1): VPU multiply + lane reduce beats an N=1
    # MXU matmul at this size.
    logits = (jnp.sum(h * cls_row[:, :H], axis=-1, keepdims=True)
              + cls_row[:, H:H + 1])
    out_ref[...] = logits.astype(out_ref.dtype)


def detector_forward(x_btd, w_all, *, hidden, batch_tile=8):
    """x_btd: (B, T, D_in) float32, batch_first (PyTorch convention).

    w_all: packed parameters from `pack_params`, shape (D_in + H + 2, 4H).
    """
    B, T, D = x_btd.shape
    H = hidden
    BT = batch_tile
    nt = (B + BT - 1) // BT
    Bp = nt * BT
    if Bp != B:
        x_btd = jnp.pad(x_btd, ((0, Bp - B), (0, 0), (0, 0)))

    # Per-tile time-major slabs: tile i, row t*BT + j  <->  (batch i*BT+j, time t)
    x_tm = jnp.transpose(x_btd, (1, 0, 2))                       # (T, Bp, D)
    x_tiles = jnp.transpose(x_tm.reshape(T, nt, BT, D),
                            (1, 0, 2, 3)).reshape(nt, T * BT, D)  # (nt, T*BT, D)

    kernel = functools.partial(_lstm_detector_kernel, hidden=H, d_in=D,
                               seq_len=T, batch_tile=BT)

    out = pl.pallas_call(
        kernel,
        out_shape=jax.ShapeDtypeStruct((Bp, 1), jnp.float32),
        grid=(nt,),
        in_specs=[
            pl.BlockSpec((None, T * BT, D), lambda i: (i, 0, 0)),
            pl.BlockSpec((D + H + 2, 4 * H), lambda i: (0, 0)),   # resident
        ],
        out_specs=pl.BlockSpec((BT, 1), lambda i: (i, 0)),
        compiler_params=pltpu.CompilerParams(
            dimension_semantics=("parallel",)),                   # v7x: 2 TCs
    )(x_tiles, w_all)
    return out[:B]


def init_torch_params(key, hidden, d_in=10):
    """Deterministic synthetic params in ORIGINAL PyTorch layout/gate order."""
    H = hidden
    ks = jax.random.split(key, 6)
    bound = 1.0 / jnp.sqrt(H)
    return {
        "w_ih": jax.random.uniform(ks[0], (4 * H, d_in), jnp.float32, -bound, bound),
        "w_hh": jax.random.uniform(ks[1], (4 * H, H), jnp.float32, -bound, bound),
        "b_ih": jax.random.uniform(ks[2], (4 * H,), jnp.float32, -bound, bound),
        "b_hh": jax.random.uniform(ks[3], (4 * H,), jnp.float32, -bound, bound),
        "w_cls": jax.random.uniform(ks[4], (1, H), jnp.float32, -bound, bound),
        "b_cls": jax.random.uniform(ks[5], (1,), jnp.float32, -bound, bound),
    }


def pack_params(raw, hidden, d_in=10):
    """Pack PyTorch-layout params into the single kernel weight array.

    Gate order is permuted (i, f, g, o) -> (i, f, o, g) so the first 3H lanes
    are sigmoid gates and the last H lanes are the tanh candidate.
    """
    H, D = hidden, d_in
    perm = jnp.concatenate([jnp.arange(0, 2 * H),
                            jnp.arange(3 * H, 4 * H),
                            jnp.arange(2 * H, 3 * H)])
    w_ih_t = raw["w_ih"][perm].T                                  # (D, 4H)
    w_hh_t = raw["w_hh"][perm].T                                  # (H, 4H)
    bias = (raw["b_ih"] + raw["b_hh"])[perm][None, :]             # (1, 4H)
    cls_row = jnp.zeros((1, 4 * H), jnp.float32)
    cls_row = cls_row.at[0, :H].set(raw["w_cls"][0])
    cls_row = cls_row.at[0, H].set(raw["b_cls"][0])
    return jnp.concatenate([w_ih_t, w_hh_t, bias, cls_row], axis=0)


def detector_reference(x_btd, raw, hidden):
    """Pure-JAX f32 reference using the ORIGINAL PyTorch weights / gate order."""
    H = hidden
    B = x_btd.shape[0]
    w_ih, w_hh = raw["w_ih"], raw["w_hh"]
    b = raw["b_ih"] + raw["b_hh"]

    def step(carry, x_t):
        h, c = carry
        gates = x_t @ w_ih.T + h @ w_hh.T + b     # PyTorch order (i, f, g, o)
        i = jax.nn.sigmoid(gates[:, 0 * H:1 * H])
        f = jax.nn.sigmoid(gates[:, 1 * H:2 * H])
        g = jnp.tanh(gates[:, 2 * H:3 * H])
        o = jax.nn.sigmoid(gates[:, 3 * H:4 * H])
        c = f * c + i * g
        h = o * jnp.tanh(c)
        return (h, c), None

    h0 = jnp.zeros((B, H), jnp.float32)
    c0 = jnp.zeros((B, H), jnp.float32)
    (h_last, _), _ = jax.lax.scan(step, (h0, c0),
                                  jnp.transpose(x_btd, (1, 0, 2)))
    return h_last @ raw["w_cls"].T + raw["b_cls"][None, :]


if __name__ == "__main__":
    B, T, D_IN, HIDDEN = 16, 8, 10, 32   # small shapes; B=16 exercises grid=(2,)

    key = jax.random.PRNGKey(0)
    kx, kp = jax.random.split(key)
    x = jax.random.normal(kx, (B, T, D_IN), jnp.float32)
    raw = init_torch_params(kp, HIDDEN, D_IN)
    w_all = pack_params(raw, HIDDEN, D_IN)

    out = detector_forward(x, w_all, hidden=HIDDEN)
    out = jax.block_until_ready(out)

    ref = detector_reference(x, raw, HIDDEN)
    assert out.shape == (B, 1)
    # Tolerance loosened vs f32 reference because MXU operands are bf16
    # (accumulation stays f32).
    max_err = jnp.max(jnp.abs(out - ref))
    assert jnp.allclose(out, ref, atol=2e-2, rtol=2e-2), (max_err, out, ref)

    print("KERNEL_OK")
</pallas_src>

<mosaic_0001>
module attributes {stable_mosaic.version = 11 : i64} {
  func.func @_lstm_detector_kernel(%arg0: i32, %arg1: memref<1x64x10xf32, #tpu.memory_space<vmem>>, %arg2: memref<44x128xf32, #tpu.memory_space<vmem>>, %arg3: memref<8x1xf32, #tpu.memory_space<vmem>>) attributes {dimension_semantics = [#tpu.dimension_semantics<parallel>], iteration_bounds = array<i64: 2>, scalar_prefetch = 0 : i64, scratch_operands = 0 : i64, tpu.core_type = #tpu.core_type<tc>, window_params = [{transform_indices = @transform_0, window_bounds = array<i64: 1, 64, 10>}, {pipeline_mode = #tpu.pipeline_mode<synchronous>, transform_indices = @transform_1, window_bounds = array<i64: 44, 128>}, {transform_indices = @transform_2, window_bounds = array<i64: 8, 1>}]} {
    %c0 = arith.constant 0 : index
    %c0_0 = arith.constant 0 : index
    %0 = vector.load %arg2[%c0, %c0_0] : memref<44x128xf32, #tpu.memory_space<vmem>>, vector<44x128xf32>
    %1 = vector.extract_strided_slice %0 {offsets = [0, 0], sizes = [10, 128], strides = [1, 1]} : vector<44x128xf32> to vector<10x128xf32>
    %2 = arith.truncf %1 : vector<10x128xf32> to vector<10x128xbf16>
    %3 = vector.extract_strided_slice %0 {offsets = [10, 0], sizes = [32, 128], strides = [1, 1]} : vector<44x128xf32> to vector<32x128xf32>
    %4 = arith.truncf %3 : vector<32x128xf32> to vector<32x128xbf16>
    %5 = vector.extract_strided_slice %0 {offsets = [42, 0], sizes = [1, 128], strides = [1, 1]} : vector<44x128xf32> to vector<1x128xf32>
    %6 = vector.extract_strided_slice %0 {offsets = [43, 0], sizes = [1, 128], strides = [1, 1]} : vector<44x128xf32> to vector<1x128xf32>
    %c0_1 = arith.constant 0 : index
    %c0_2 = arith.constant 0 : index
    %c0_3 = arith.constant 0 : index
    %7 = vector.load %arg1[%c0_1, %c0_2, %c0_3] : memref<1x64x10xf32, #tpu.memory_space<vmem>>, vector<1x64x10xf32>
    %8 = vector.shape_cast %7 : vector<1x64x10xf32> to vector<64x10xf32>
    %9 = arith.truncf %8 : vector<64x10xf32> to vector<64x10xbf16>
    %cst = arith.constant dense<0.000000e+00> : vector<64x128xf32>
    %10 = tpu.matmul %9, %2, %cst {dimension_numbers = #tpu.dot_dimension_numbers<[1], [0], [0], [1], [0, 0, 1, 1], [], []>} : vector<64x10xbf16>, vector<10x128xbf16>, vector<64x128xf32> -> vector<64x128xf32>
    %11 = vector.broadcast %5 : vector<1x128xf32> to vector<64x128xf32>
    %12 = arith.addf %10, %11 : vector<64x128xf32>
    %13 = tpu.iota {dimensions = array<i32: 1>} : vector<8x128xi32>
    %c96_i32 = arith.constant 96 : i32
    %14 = vector.broadcast %c96_i32 : i32 to vector<8x128xi32>
    %15 = arith.cmpi slt, %13, %14 : vector<8x128xi32>
    %cst_4 = arith.constant 5.000000e-01 : f32
    %cst_5 = arith.constant 1.000000e+00 : f32
    %16 = vector.broadcast %cst_4 : f32 to vector<8x128xf32>
    %17 = vector.broadcast %cst_5 : f32 to vector<8x128xf32>
    %18 = arith.select %15, %16, %17 : vector<8x128xi1>, vector<8x128xf32>
    %cst_6 = arith.constant 5.000000e-01 : f32
    %cst_7 = arith.constant 0.000000e+00 : f32
    %19 = vector.broadcast %cst_6 : f32 to vector<8x128xf32>
    %20 = vector.broadcast %cst_7 : f32 to vector<8x128xf32>
    %21 = arith.select %15, %19, %20 : vector<8x128xi1>, vector<8x128xf32>
    %cst_8 = arith.constant 0.000000e+00 : f32
    %22 = vector.broadcast %cst_8 : f32 to vector<8x32xf32>
    %cst_9 = arith.constant 0.000000e+00 : f32
    %23 = vector.broadcast %cst_9 : f32 to vector<8x32xf32>
    %24 = vector.extract_strided_slice %12 {offsets = [0, 0], sizes = [8, 128], strides = [1, 1]} : vector<64x128xf32> to vector<8x128xf32>
    %25 = arith.truncf %22 : vector<8x32xf32> to vector<8x32xbf16>
    %cst_10 = arith.constant dense<0.000000e+00> : vector<8x128xf32>
    %26 = tpu.matmul %25, %4, %cst_10 {dimension_numbers = #tpu.dot_dimension_numbers<[1], [0], [0], [1], [0, 0, 1, 1], [], []>} : vector<8x32xbf16>, vector<32x128xbf16>, vector<8x128xf32> -> vector<8x128xf32>
    %27 = arith.addf %24, %26 : vector<8x128xf32>
    %28 = arith.mulf %18, %27 : vector<8x128xf32>
    %29 = math.tanh %28 : vector<8x128xf32>
    %30 = arith.mulf %18, %29 : vector<8x128xf32>
    %31 = arith.addf %30, %21 : vector<8x128xf32>
    %32 = vector.extract_strided_slice %31 {offsets = [0, 0], sizes = [8, 32], strides = [1, 1]} : vector<8x128xf32> to vector<8x32xf32>
    %33 = vector.extract_strided_slice %31 {offsets = [0, 32], sizes = [8, 32], strides = [1, 1]} : vector<8x128xf32> to vector<8x32xf32>
    %34 = vector.extract_strided_slice %31 {offsets = [0, 64], sizes = [8, 32], strides = [1, 1]} : vector<8x128xf32> to vector<8x32xf32>
    %35 = vector.extract_strided_slice %31 {offsets = [0, 96], sizes = [8, 32], strides = [1, 1]} : vector<8x128xf32> to vector<8x32xf32>
    %36 = arith.mulf %33, %23 : vector<8x32xf32>
    %37 = arith.mulf %32, %35 : vector<8x32xf32>
    %38 = arith.addf %36, %37 : vector<8x32xf32>
    %39 = math.tanh %38 : vector<8x32xf32>
    %40 = arith.mulf %34, %39 : vector<8x32xf32>
    %41 = vector.extract_strided_slice %12 {offsets = [8, 0], sizes = [8, 128], strides = [1, 1]} : vector<64x128xf32> to vector<8x128xf32>
    %42 = arith.truncf %40 : vector<8x32xf32> to vector<8x32xbf16>
    %cst_11 = arith.constant dense<0.000000e+00> : vector<8x128xf32>
    %43 = tpu.matmul %42, %4, %cst_11 {dimension_numbers = #tpu.dot_dimension_numbers<[1], [0], [0], [1], [0, 0, 1, 1], [], []>} : vector<8x32xbf16>, vector<32x128xbf16>, vector<8x128xf32> -> vector<8x128xf32>
    %44 = arith.addf %41, %43 : vector<8x128xf32>
    %45 = arith.mulf %18, %44 : vector<8x128xf32>
    %46 = math.tanh %45 : vector<8x128xf32>
    %47 = arith.mulf %18, %46 : vector<8x128xf32>
    %48 = arith.addf %47, %21 : vector<8x128xf32>
    %49 = vector.extract_strided_slice %48 {offsets = [0, 0], sizes = [8, 32], strides = [1, 1]} : vector<8x128xf32> to vector<8x32xf32>
    %50 = vector.extract_strided_slice %48 {offsets = [0, 32], sizes = [8, 32], strides = [1, 1]} : vector<8x128xf32> to vector<8x32xf32>
    %51 = vector.extract_strided_slice %48 {offsets = [0, 64], sizes = [8, 32], strides = [1, 1]} : vector<8x128xf32> to vector<8x32xf32>
    %52 = vector.extract_strided_slice %48 {offsets = [0, 96], sizes = [8, 32], strides = [1, 1]} : vector<8x128xf32> to vector<8x32xf32>
    %53 = arith.mulf %50, %38 : vector<8x32xf32>
    %54 = arith.mulf %49, %52 : vector<8x32xf32>
    %55 = arith.addf %53, %54 : vector<8x32xf32>
    %56 = math.tanh %55 : vector<8x32xf32>
    %57 = arith.mulf %51, %56 : vector<8x32xf32>
    %58 = vector.extract_strided_slice %12 {offsets = [16, 0], sizes = [8, 128], strides = [1, 1]} : vector<64x128xf32> to vector<8x128xf32>
    %59 = arith.truncf %57 : vector<8x32xf32> to vector<8x32xbf16>
    %cst_12 = arith.constant dense<0.000000e+00> : vector<8x128xf32>
    %60 = tpu.matmul %59, %4, %cst_12 {dimension_numbers = #tpu.dot_dimension_numbers<[1], [0], [0], [1], [0, 0, 1, 1], [], []>} : vector<8x32xbf16>, vector<32x128xbf16>, vector<8x128xf32> -> vector<8x128xf32>
    %61 = arith.addf %58, %60 : vector<8x128xf32>
    %62 = arith.mulf %18, %61 : vector<8x128xf32>
    %63 = math.tanh %62 : vector<8x128xf32>
    %64 = arith.mulf %18, %63 : vector<8x128xf32>
    %65 = arith.addf %64, %21 : vector<8x128xf32>
    %66 = vector.extract_strided_slice %65 {offsets = [0, 0], sizes = [8, 32], strides = [1, 1]} : vector<8x128xf32> to vector<8x32xf32>
    %67 = vector.extract_strided_slice %65 {offsets = [0, 32], sizes = [8, 32], strides = [1, 1]} : vector<8x128xf32> to vector<8x32xf32>
    %68 = vector.extract_strided_slice %65 {offsets = [0, 64], sizes = [8, 32], strides = [1, 1]} : vector<8x128xf32> to vector<8x32xf32>
    %69 = vector.extract_strided_slice %65 {offsets = [0, 96], sizes = [8, 32], strides = [1, 1]} : vector<8x128xf32> to vector<8x32xf32>
    %70 = arith.mulf %67, %55 : vector<8x32xf32>
    %71 = arith.mulf %66, %69 : vector<8x32xf32>
    %72 = arith.addf %70, %71 : vector<8x32xf32>
    %73 = math.tanh %72 : vector<8x32xf32>
    %74 = arith.mulf %68, %73 : vector<8x32xf32>
    %75 = vector.extract_strided_slice %12 {offsets = [24, 0], sizes = [8, 128], strides = [1, 1]} : vector<64x128xf32> to vector<8x128xf32>
    %76 = arith.truncf %74 : vector<8x32xf32> to vector<8x32xbf16>
    %cst_13 = arith.constant dense<0.000000e+00> : vector<8x128xf32>
    %77 = tpu.matmul %76, %4, %cst_13 {dimension_numbers = #tpu.dot_dimension_numbers<[1], [0], [0], [1], [0, 0, 1, 1], [], []>} : vector<8x32xbf16>, vector<32x128xbf16>, vector<8x128xf32> -> vector<8x128xf32>
    %78 = arith.addf %75, %77 : vector<8x128xf32>
    %79 = arith.mulf %18, %78 : vector<8x128xf32>
    %80 = math.tanh %79 : vector<8x128xf32>
    %81 = arith.mulf %18, %80 : vector<8x128xf32>
    %82 = arith.addf %81, %21 : vector<8x128xf32>
    %83 = vector.extract_strided_slice %82 {offsets = [0, 0], sizes = [8, 32], strides = [1, 1]} : vector<8x128xf32> to vector<8x32xf32>
    %84 = vector.extract_strided_slice %82 {offsets = [0, 32], sizes = [8, 32], strides = [1, 1]} : vector<8x128xf32> to vector<8x32xf32>
    %85 = vector.extract_strided_slice %82 {offsets = [0, 64], sizes = [8, 32], strides = [1, 1]} : vector<8x128xf32> to vector<8x32xf32>
    %86 = vector.extract_strided_slice %82 {offsets = [0, 96], sizes = [8, 32], strides = [1, 1]} : vector<8x128xf32> to vector<8x32xf32>
    %87 = arith.mulf %84, %72 : vector<8x32xf32>
    %88 = arith.mulf %83, %86 : vector<8x32xf32>
    %89 = arith.addf %87, %88 : vector<8x32xf32>
    %90 = math.tanh %89 : vector<8x32xf32>
    %91 = arith.mulf %85, %90 : vector<8x32xf32>
    %92 = vector.extract_strided_slice %12 {offsets = [32, 0], sizes = [8, 128], strides = [1, 1]} : vector<64x128xf32> to vector<8x128xf32>
    %93 = arith.truncf %91 : vector<8x32xf32> to vector<8x32xbf16>
    %cst_14 = arith.constant dense<0.000000e+00> : vector<8x128xf32>
    %94 = tpu.matmul %93, %4, %cst_14 {dimension_numbers = #tpu.dot_dimension_numbers<[1], [0], [0], [1], [0, 0, 1, 1], [], []>} : vector<8x32xbf16>, vector<32x128xbf16>, vector<8x128xf32> -> vector<8x128xf32>
    %95 = arith.addf %92, %94 : vector<8x128xf32>
    %96 = arith.mulf %18, %95 : vector<8x128xf32>
    %97 = math.tanh %96 : vector<8x128xf32>
    %98 = arith.mulf %18, %97 : vector<8x128xf32>
    %99 = arith.addf %98, %21 : vector<8x128xf32>
    %100 = vector.extract_strided_slice %99 {offsets = [0, 0], sizes = [8, 32], strides = [1, 1]} : vector<8x128xf32> to vector<8x32xf32>
    %101 = vector.extract_strided_slice %99 {offsets = [0, 32], sizes = [8, 32], strides = [1, 1]} : vector<8x128xf32> to vector<8x32xf32>
    %102 = vector.extract_strided_slice %99 {offsets = [0, 64], sizes = [8, 32], strides = [1, 1]} : vector<8x128xf32> to vector<8x32xf32>
    %103 = vector.extract_strided_slice %99 {offsets = [0, 96], sizes = [8, 32], strides = [1, 1]} : vector<8x128xf32> to vector<8x32xf32>
    %104 = arith.mulf %101, %89 : vector<8x32xf32>
    %105 = arith.mulf %100, %103 : vector<8x32xf32>
    %106 = arith.addf %104, %105 : vector<8x32xf32>
    %107 = math.tanh %106 : vector<8x32xf32>
    %108 = arith.mulf %102, %107 : vector<8x32xf32>
    %109 = vector.extract_strided_slice %12 {offsets = [40, 0], sizes = [8, 128], strides = [1, 1]} : vector<64x128xf32> to vector<8x128xf32>
    %110 = arith.truncf %108 : vector<8x32xf32> to vector<8x32xbf16>
    %cst_15 = arith.constant dense<0.000000e+00> : vector<8x128xf32>
    %111 = tpu.matmul %110, %4, %cst_15 {dimension_numbers = #tpu.dot_dimension_numbers<[1], [0], [0], [1], [0, 0, 1, 1], [], []>} : vector<8x32xbf16>, vector<32x128xbf16>, vector<8x128xf32> -> vector<8x128xf32>
    %112 = arith.addf %109, %111 : vector<8x128xf32>
    %113 = arith.mulf %18, %112 : vector<8x128xf32>
    %114 = math.tanh %113 : vector<8x128xf32>
    %115 = arith.mulf %18, %114 : vector<8x128xf32>
    %116 = arith.addf %115, %21 : vector<8x128xf32>
    %117 = vector.extract_strided_slice %116 {offsets = [0, 0], sizes = [8, 32], strides = [1, 1]} : vector<8x128xf32> to vector<8x32xf32>
    %118 = vector.extract_strided_slice %116 {offsets = [0, 32], sizes = [8, 32], strides = [1, 1]} : vector<8x128xf32> to vector<8x32xf32>
    %119 = vector.extract_strided_slice %116 {offsets = [0, 64], sizes = [8, 32], strides = [1, 1]} : vector<8x128xf32> to vector<8x32xf32>
    %120 = vector.extract_strided_slice %116 {offsets = [0, 96], sizes = [8, 32], strides = [1, 1]} : vector<8x128xf32> to vector<8x32xf32>
    %121 = arith.mulf %118, %106 : vector<8x32xf32>
    %122 = arith.mulf %117, %120 : vector<8x32xf32>
    %123 = arith.addf %121, %122 : vector<8x32xf32>
    %124 = math.tanh %123 : vector<8x32xf32>
    %125 = arith.mulf %119, %124 : vector<8x32xf32>
    %126 = vector.extract_strided_slice %12 {offsets = [48, 0], sizes = [8, 128], strides = [1, 1]} : vector<64x128xf32> to vector<8x128xf32>
    %127 = arith.truncf %125 : vector<8x32xf32> to vector<8x32xbf16>
    %cst_16 = arith.constant dense<0.000000e+00> : vector<8x128xf32>
    %128 = tpu.matmul %127, %4, %cst_16 {dimension_numbers = #tpu.dot_dimension_numbers<[1], [0], [0], [1], [0, 0, 1, 1], [], []>} : vector<8x32xbf16>, vector<32x128xbf16>, vector<8x128xf32> -> vector<8x128xf32>
    %129 = arith.addf %126, %128 : vector<8x128xf32>
    %130 = arith.mulf %18, %129 : vector<8x128xf32>
    %131 = math.tanh %130 : vector<8x128xf32>
    %132 = arith.mulf %18, %131 : vector<8x128xf32>
    %133 = arith.addf %132, %21 : vector<8x128xf32>
    %134 = vector.extract_strided_slice %133 {offsets = [0, 0], sizes = [8, 32], strides = [1, 1]} : vector<8x128xf32> to vector<8x32xf32>
    %135 = vector.extract_strided_slice %133 {offsets = [0, 32], sizes = [8, 32], strides = [1, 1]} : vector<8x128xf32> to vector<8x32xf32>
    %136 = vector.extract_strided_slice %133 {offsets = [0, 64], sizes = [8, 32], strides = [1, 1]} : vector<8x128xf32> to vector<8x32xf32>
    %137 = vector.extract_strided_slice %133 {offsets = [0, 96], sizes = [8, 32], strides = [1, 1]} : vector<8x128xf32> to vector<8x32xf32>
    %138 = arith.mulf %135, %123 : vector<8x32xf32>
    %139 = arith.mulf %134, %137 : vector<8x32xf32>
    %140 = arith.addf %138, %139 : vector<8x32xf32>
    %141 = math.tanh %140 : vector<8x32xf32>
    %142 = arith.mulf %136, %141 : vector<8x32xf32>
    %143 = vector.extract_strided_slice %12 {offsets = [56, 0], sizes = [8, 128], strides = [1, 1]} : vector<64x128xf32> to vector<8x128xf32>
    %144 = arith.truncf %142 : vector<8x32xf32> to vector<8x32xbf16>
    %cst_17 = arith.constant dense<0.000000e+00> : vector<8x128xf32>
    %145 = tpu.matmul %144, %4, %cst_17 {dimension_numbers = #tpu.dot_dimension_numbers<[1], [0], [0], [1], [0, 0, 1, 1], [], []>} : vector<8x32xbf16>, vector<32x128xbf16>, vector<8x128xf32> -> vector<8x128xf32>
    %146 = arith.addf %143, %145 : vector<8x128xf32>
    %147 = arith.mulf %18, %146 : vector<8x128xf32>
    %148 = math.tanh %147 : vector<8x128xf32>
    %149 = arith.mulf %18, %148 : vector<8x128xf32>
    %150 = arith.addf %149, %21 : vector<8x128xf32>
    %151 = vector.extract_strided_slice %150 {offsets = [0, 0], sizes = [8, 32], strides = [1, 1]} : vector<8x128xf32> to vector<8x32xf32>
    %152 = vector.extract_strided_slice %150 {offsets = [0, 32], sizes = [8, 32], strides = [1, 1]} : vector<8x128xf32> to vector<8x32xf32>
    %153 = vector.extract_strided_slice %150 {offsets = [0, 64], sizes = [8, 32], strides = [1, 1]} : vector<8x128xf32> to vector<8x32xf32>
    %154 = vector.extract_strided_slice %150 {offsets = [0, 96], sizes = [8, 32], strides = [1, 1]} : vector<8x128xf32> to vector<8x32xf32>
    %155 = arith.mulf %152, %140 : vector<8x32xf32>
    %156 = arith.mulf %151, %154 : vector<8x32xf32>
    %157 = arith.addf %155, %156 : vector<8x32xf32>
    %158 = math.tanh %157 : vector<8x32xf32>
    %159 = arith.mulf %153, %158 : vector<8x32xf32>
    %160 = vector.extract_strided_slice %6 {offsets = [0, 0], sizes = [1, 32], strides = [1, 1]} : vector<1x128xf32> to vector<1x32xf32>
    %161 = vector.broadcast %160 : vector<1x32xf32> to vector<8x32xf32>
    %162 = arith.mulf %159, %161 : vector<8x32xf32>
    %cst_18 = arith.constant dense<0.000000e+00> : vector<8xf32>
    %163 = vector.multi_reduction <add>, %162, %cst_18 [1] : vector<8x32xf32> to vector<8xf32>
    %164 = vector.shape_cast %163 : vector<8xf32> to vector<8x1xf32>
    %165 = vector.extract_strided_slice %6 {offsets = [0, 32], sizes = [1, 1], strides = [1, 1]} : vector<1x128xf32> to vector<1x1xf32>
    %166 = vector.broadcast %165 : vector<1x1xf32> to vector<8x1xf32>
    %167 = arith.addf %164, %166 : vector<8x1xf32>
    %c0_19 = arith.constant 0 : index
    %c0_20 = arith.constant 0 : index
    %168 = vector.load %arg3[%c0_19, %c0_20] : memref<8x1xf32, #tpu.memory_space<vmem>>, vector<8x1xf32>
    tpu.vector_store %arg3[%c0_19, %c0_20], %167 {strides = array<i32>} : memref<8x1xf32, #tpu.memory_space<vmem>>, vector<8x1xf32>,
    return
  }
  func.func @transform_0(%arg0: i32) -> (i32, i32, i32) {
    %c0_i32 = arith.constant 0 : i32
    %c0_i32_0 = arith.constant 0 : i32
    %c0_i32_1 = arith.constant 0 : i32
    return %arg0, %c0_i32, %c0_i32_0 : i32, i32, i32
  }
  func.func @transform_1(%arg0: i32) -> (i32, i32) {
    %c0_i32 = arith.constant 0 : i32
    %c0_i32_0 = arith.constant 0 : i32
    %c0_i32_1 = arith.constant 0 : i32
    return %c0_i32, %c0_i32_0 : i32, i32
  }
  func.func @transform_2(%arg0: i32) -> (i32, i32) {
    %c0_i32 = arith.constant 0 : i32
    %c0_i32_0 = arith.constant 0 : i32
    return %arg0, %c0_i32 : i32, i32
  }
}

</mosaic_0001>

<bundles_post_ra>
// kernel: tpu_custom_call.1
= control target key start
LH: loop header
LB: loop body
LE: loop exit
PB: predicated region body
PF: predicated region fallthrough
CT: control target
= control target key end

     0   :  { %s1095_s9 = smov 0   ;;  %s1310_s0 = inlined_call_operand.vmem [shape: f32[2,64,10], index: 0, kind: input, shape index: {}]   ;;  %s1311_s1 = inlined_call_operand.vmem [shape: f32[44,128], index: 1, kind: input, shape index: {}]   ;;  %s1312_s2 = inlined_call_operand.vmem [shape: f32[16,1], index: 2, kind: output, shape index: {}]  }
   0x1 LB: > { %s892_s10 = sadd.s32 4294967295, %s1071_s9   ;;  %p896_p0 = scmp.ge.s32.totalorder %s1071_s9, 1  ;;  %s1071_s9 = sphi %s1095_s9, %s12_s9  }
   0x2   : > { %p112_p1 = scmp.lt.s32.totalorder %s1071_s9, 3 }
   0x4   : > { %p113_p2 = pnand %p896_p0, %p112_p1 }
   0x5   : > { %p133_p3 = scmp.lt.s32.totalorder (!%p113_p2), %s892_s10, 1  ;;  %s1077_s27 = smov (!%p113_p2), 32  }
   0x6   : > { %116 = sbr.rel (%p113_p2) target bundleno = 5858 (0x16e2), region = 28  ;;  %s1078_s28 = smov (!%p113_p2), 64  }
   0x7   : > { %s1079_s29 = smov (!%p113_p2), 96  }
   0xb   : > { %v143_v0 = vld [vmem:[%s1311_s1] sm:$0xff]  ;;  %v144_v1 = vld [vmem:[%s1311_s1 + $0x8] sm:$0xff]  ;;  %v145_v2 = vld [vmem:[%s1311_s1 + $0x10] sm:$0xff]  ;;  %vm182_vm0 = vcmask 1044480   ;;  %v1073_v3 = vmov 0.0   ;;  %vm259_vm1 = vcmask 1046528   ;;  %v165_v24 = vlaneseq }
   0xc   : > { %953 = vmatprep.subr.bf16.mxu1 %v1073_v3  ;;  %v146_v4 = vld [vmem:[%s1311_s1 + $0x18] sm:$0xff]  ;;  %v147_v5 = vld [vmem:[%s1311_s1 + $0x20] sm:$0xff]  ;;  %v1122_v6 = vld [vmem:[%s1311_s1 + $0x28] sm:$0xf]  ;;  %v149_v7 = vpack.c.bf16 %v144_v1, %v143_v0  ;;  %v150_v8 = vpack.c.bf16 %v145_v2, %v144_v1  ;;  %s1314_s10 = smov (!%p133_p3, %s892_s10), 1  ;;  %vm1074_vm2 = vmmov 0  }
   0xd   : > { %v151_v9 = vpack.c.bf16 %v147_v5, %v146_v4  ;;  %v152_v10 = vpack.c.bf16 %v1122_v6, %v1122_v6  ;;  %957 = vmatprep.mubr.msk.bf16.mxu1 %vm1074_vm2, %v1073_v3  ;;  %s913_s23 = sshll.u32 %s1314_s10, 6  ;;  %vm169_vm3 = vcmask 80896   ;;  %v1075_v23 = vmov 0   ;;  %s899_s30 = sshll.u32 %s1314_s10, 3 }
   0xe   : > { %1017 = vmatprep.subr.msk.bf16.mxu0 %vm182_vm0, %v149_v7  ;;  %v184_v11 = vsel %vm182_vm0, %v149_v7, 0  ;;  %v260_v12 = vrot.slane %v150_v8, 1  ;;  %s1138_s26 = scalar_lea.vmem %s1310_s0, %s913_s23  ;;  %v1163_v25 = vshrl.u32 %v165_v24, 7  ;;  %v252_v27 = vand.u32 127, %v165_v24  ;;  %s141_s5 = scalar_lea.vmem %s1312_s2, %s899_s30 }
   0xf   : > { %v261_v13 = vrot.slane %v151_v9, 1  ;;  %v263_v14 = vrot.slane %v152_v10, 1  ;;  %944 = vmatpush3.bf16.msra.mxu0 %v184_v11  ;;  %v153_v16 = vld [vmem:[%s1138_s26] sm:$0xff]  ;;  %v154_v17 = vld [vmem:[%s1138_s26 + $0x8] sm:$0xff]  ;;  %v155_v18 = vld [vmem:[%s1138_s26 + $0x10] sm:$0xff]  ;;  %v1076_v33 = vmov 1.0  }
  0x10   : > { %969 = vmatprep.subr.bf16.mxu0 %v1073_v3  ;;  %v161_v20 = vpack.c.bf16 %v154_v17, %v153_v16  ;;  %v156_v21 = vld [vmem:[%s1138_s26 + $0x18] sm:$0xff]  ;;  %v167_v26 = vsub.s32 2, %v1163_v25  ;;  %vm253_vm4 = vcmp.lt.s32.totalorder %v252_v27, 96  ;;  %vm267_vm5 = vcmask 261120   ;;  %v157_v9 = vld [vmem:[%s1138_s26 + $0x20] sm:$0xff]  ;;  %v158_v10 = vld [vmem:[%s1138_s26 + $0x28] sm:$0xff] }
  0x11   : > { %v1133_v15 = vsel %vm259_vm1, %v261_v13, %v263_v14  ;;  %v1145_v19 = vsel %vm259_vm1, %v260_v12, %v261_v13  ;;  %v162_v22 = vpack.c.bf16 %v156_v21, %v155_v18  ;;  %v1172_v34 = vsel %vm253_vm4, 0.5, %v1076_v33  ;;  %v159_v11 = vld [vmem:[%s1138_s26 + $0x30] sm:$0xff]  ;;  %v160_v13 = vld [vmem:[%s1138_s26 + $0x38] sm:$0xff] }
  0x12   : > { %954 = vmatpush3.bf16.msra.mxu1 %v1133_v15  ;;  %945 = vmatprep.mubr.msk.bf16.mxu0 %vm169_vm3, %v161_v20  ;;  %v1169_v29 = vrot.slane %v1122_v6, %v167_v26  ;;  %v1176_v41 = vsel %vm253_vm4, 0.5, %v1073_v3  ;;  %v163_v12 = vpack.c.bf16 %v158_v10, %v157_v9  ;;  %v164_v14 = vpack.c.bf16 %v160_v13, %v159_v11 }
  0x13   : > { %955 = vmatprep.subr.bf16.mxu1 %v1073_v3  ;;  %946 = vmatmul.mubr.msk.bf16.vlgmr.msra.gmra.mxu0 %vm169_vm3, %v162_v22  ;;  %vm837_vm6 = vcmask 7168  }
  0x14   : > { %970 = vmatpush3.bf16.msra.mxu0 %v1133_v15  ;;  %949 = vmatprep.mubr.msk.bf16.mxu0 %vm169_vm3, %v163_v12 }
  0x15   : > { %971 = vmatprep.subr.bf16.mxu0 %v1073_v3 }
  0x16   : > { %956 = vmatpush3.bf16.msra.mxu1 %v1145_v19 }
  0x17   : > { %961 = vmatprep.subr.bf16.mxu1 %v1073_v3 }
  0x18   : > { %972 = vmatpush3.bf16.msra.mxu0 %v1145_v19 }
  0x19   : > { %958 = vmatmul.mubr.bf16.vlgmr.msra.gmra.mxu1 %v1075_v23  ;;  %985 = vmatprep.subr.bf16.mxu0 %v1073_v3 }
  0x1a   : > { %962 = vmatpush3.bf16.msra.mxu1 %v1133_v15  ;;  %965 = vmatprep.mubr.msk.bf16.mxu1 %vm1074_vm2, %v1073_v3 }
  0x1b   : > { %963 = vmatprep.subr.bf16.mxu1 %v1073_v3  ;;  %950 = vmatmul.mubr.msk.bf16.gmra.mxu0 %vm169_vm3, %v164_v14 }
  0x1c   : > { %973 = vmatprep.mubr.msk.bf16.mxu0 %vm1074_vm2, %v1073_v3 }
  0x1e   : > { %964 = vmatpush3.bf16.msra.mxu1 %v1145_v19 }
  0x1f   : > { %977 = vmatprep.subr.bf16.mxu1 %v1073_v3 }
  0xd3   : > { %v1166_v28 = vpop.f32.mrf.mxu0 }
  0xd4   : > { %v229_v27 = vadd.f32 %v1166_v28, %v1169_v29 }
  0xd5   : > { %v220_v30 = vpop.f32.mrf.mxu0 }
  0xd6   : > { %v221_v31 = vadd.f32 %v220_v30, %v1169_v29 }
  0xd7   : > { %v1191_v54 = vpop.f32.mrf.mxu0 }
  0xd9   : > { %v305_v32 = vpop.f32.mrf.mxu1  ;;  %v223_v55 = vpop.f32.mrf.mxu0 }
  0xda   : > { %v311_v35 = vadd.f32 %v305_v32, %v221_v31  ;;  %v224_v56 = vadd.f32 %v223_v55, %v1169_v29 }
  0xdb   : > { %v959_v36 = vpop.f32.mrf.mxu1  ;;  %v1216_v22 = vpop.f32.mrf.mxu0 }
  0xdc   : > { %v312_v37 = vmul.f32 %v311_v35, %v1172_v34 }
  0xdd   : > { %v308_v38 = vpop.f32.mrf.mxu1  ;;  %v1218_v23 = vpop.f32.mrf.mxu0 }
  0xde   : > { %1033 = vtanh.f32 %v312_v37 }
  0xdf   : > { %v960_v39 = vpop.f32.mrf.mxu1  ;;  %v1220_v24 = vpop.f32.mrf.mxu0 }
  0xe1   : > { %v1222_v26 = vpop.f32.mrf.mxu0 }
  0xeb   : > { %v1034_v40 = vpop.eup %1033 }
  0xec   : > { %v314_v42 = vmul.f32 %v1034_v40, %v1172_v34 }
  0xee   : > { %v315_v43 = vadd.f32 %v314_v42, %v1176_v41 }
  0xf0   : > { %318 = vrot.lane.b32.xlu0 %v315_v43, %s1077_s27  ;;  %v316_v46 = vmul.f32 0.0, %v315_v43 }
 0x162   : > { %v319_v44 = vpop.permute.xlu0 %318 }
 0x163   : > { %v321_v45 = vmul.f32 %v319_v44, %v315_v43 }
 0x165   : > { %323 = vrot.lane.b32.xlu0 %v321_v45, %s1077_s27 }
 0x1d7   : > { %v324_v47 = vpop.permute.xlu0 %323 }
 0x1d8   : > { %v326_v48 = vadd.f32 %v324_v47, %v316_v46 }
 0x1da   : > { %1035 = vtanh.f32 %v326_v48 }
 0x1e7   : > { %v1036_v49 = vpop.eup %1035 }
 0x1e8   : > { %329 = vrot.lane.b32.xlu1 %v1036_v49, %s1077_s27 }
 0x25a   : > { %v330_v50 = vpop.permute.xlu1 %329 }
 0x25b   : > { %v332_v51 = vmul.f32 %v330_v50, %v315_v43  ;;  %v232_v50 = vadd.f32 %v1191_v54, %v1169_v29 }
 0x25d   : > { %v333_v52 = vpack.c.bf16 %v332_v51, %v332_v51 }
 0x25f   : > { %335 = vrot.lane.b32.xlu1 %v333_v52, %s1078_s28 }
 0x2d1   : > { %v336_v53 = vpop.permute.xlu1 %335 }
 0x2d2   : > { %966 = vmatmul.mubr.msk.bf16.vlgmr.msra.gmra.mxu1 %vm267_vm5, %v336_v53 }
 0x2d3   : > { %978 = vmatpush3.bf16.msra.mxu1 %v1133_v15  ;;  %981 = vmatprep.mubr.msk.bf16.mxu1 %vm1074_vm2, %v1073_v3 }
 0x2d4   : > { %979 = vmatprep.subr.bf16.mxu1 %v1073_v3 }
 0x2d7   : > { %980 = vmatpush3.bf16.msra.mxu1 %v1145_v19 }
 0x2d8   : > { %993 = vmatprep.subr.bf16.mxu1 %v1073_v3 }
 0x392   : > { %v374_v57 = vpop.f32.mrf.mxu1 }
 0x393   : > { %v380_v58 = vadd.f32 %v374_v57, %v224_v56 }
 0x394   : > { %v967_v59 = vpop.f32.mrf.mxu1 }
 0x395   : > { %v381_v60 = vmul.f32 %v380_v58, %v1172_v34 }
 0x396   : > { %v377_v61 = vpop.f32.mrf.mxu1 }
 0x397   : > { %1037 = vtanh.f32 %v381_v60 }
 0x398   : > { %v968_v62 = vpop.f32.mrf.mxu1 }
 0x3a4   : > { %v1038_v63 = vpop.eup %1037 }
 0x3a5   : > { %v383_v0 = vmul.f32 %v1038_v63, %v1172_v34 }
 0x3a7   : > { %v384_v1 = vadd.f32 %v383_v0, %v1176_v41 }
 0x3a9   : > { %387 = vrot.lane.b32.xlu0 %v384_v1, %s1077_s27  ;;  %v385_v5 = vmul.f32 %v384_v1, %v326_v48 }
 0x41b   : > { %v388_v2 = vpop.permute.xlu0 %387 }
 0x41c   : > { %v390_v4 = vmul.f32 %v388_v2, %v384_v1 }
 0x41e   : > { %392 = vrot.lane.b32.xlu1 %v390_v4, %s1077_s27 }
 0x490   : > { %v393_v7 = vpop.permute.xlu1 %392 }
 0x491   : > { %v395_v8 = vadd.f32 %v393_v7, %v385_v5 }
 0x493   : > { %1039 = vtanh.f32 %v395_v8 }
 0x4a0   : > { %v1040_v16 = vpop.eup %1039 }
 0x4a1   : > { %398 = vrot.lane.b32.xlu0 %v1040_v16, %s1077_s27 }
 0x513   : > { %v399_v17 = vpop.permute.xlu0 %398 }
 0x514   : > { %v401_v18 = vmul.f32 %v399_v17, %v384_v1 }
 0x516   : > { %v402_v20 = vpack.c.bf16 %v401_v18, %v401_v18 }
 0x518   : > { %404 = vrot.lane.b32.xlu1 %v402_v20, %s1078_s28 }
 0x58a   : > { %v405_v21 = vpop.permute.xlu1 %404 }
 0x58b   : > { %974 = vmatmul.mubr.msk.bf16.vlgmr.msra.gmra.mxu0 %vm267_vm5, %v405_v21 }
 0x58c   : > { %986 = vmatpush3.bf16.msra.mxu0 %v1133_v15  ;;  %989 = vmatprep.mubr.msk.bf16.mxu0 %vm1074_vm2, %v1073_v3 }
 0x58d   : > { %987 = vmatprep.subr.bf16.mxu0 %v1073_v3 }
 0x590   : > { %988 = vmatpush3.bf16.msra.mxu0 %v1145_v19 }
 0x591   : > { %1001 = vmatprep.subr.bf16.mxu0 %v1073_v3 }
 0x64b   : > { %v443_v30 = vpop.f32.mrf.mxu0 }
 0x64c   : > { %v449_v31 = vadd.f32 %v443_v30, %v229_v27 }
 0x64d   : > { %v975_v32 = vpop.f32.mrf.mxu0 }
 0x64e   : > { %v450_v33 = vmul.f32 %v449_v31, %v1172_v34 }
 0x64f   : > { %v446_v35 = vpop.f32.mrf.mxu0 }
 0x650   : > { %1041 = vtanh.f32 %v450_v33 }
 0x651   : > { %v976_v36 = vpop.f32.mrf.mxu0 }
 0x65d   : > { %v1042_v37 = vpop.eup %1041 }
 0x65e   : > { %v452_v38 = vmul.f32 %v1042_v37, %v1172_v34  ;;  %v240_v37 = vadd.f32 %v1222_v26, %v1169_v29 }
 0x660   : > { %v453_v39 = vadd.f32 %v452_v38, %v1176_v41 }
 0x662   : > { %456 = vrot.lane.b32.xlu0 %v453_v39, %s1077_s27  ;;  %v454_v28 = vmul.f32 %v453_v39, %v395_v8  ;;  %v237_v8 = vadd.f32 %v1218_v23, %v1169_v29 }
 0x6d4   : > { %v457_v40 = vpop.permute.xlu0 %456 }
 0x6d5   : > { %v459_v42 = vmul.f32 %v457_v40, %v453_v39 }
 0x6d7   : > { %461 = vrot.lane.b32.xlu1 %v459_v42, %s1077_s27 }
 0x749   : > { %v462_v43 = vpop.permute.xlu1 %461 }
 0x74a   : > { %v464_v44 = vadd.f32 %v462_v43, %v454_v28 }
 0x74c   : > { %1043 = vtanh.f32 %v464_v44 }
 0x759   : > { %v1044_v45 = vpop.eup %1043 }
 0x75a   : > { %467 = vrot.lane.b32.xlu0 %v1044_v45, %s1077_s27 }
 0x7cc   : > { %v468_v46 = vpop.permute.xlu0 %467 }
 0x7cd   : > { %v470_v47 = vmul.f32 %v468_v46, %v453_v39 }
 0x7cf   : > { %v471_v48 = vpack.c.bf16 %v470_v47, %v470_v47 }
 0x7d1   : > { %473 = vrot.lane.b32.xlu1 %v471_v48, %s1078_s28 }
 0x843   : > { %v474_v49 = vpop.permute.xlu1 %473 }
 0x844   : > { %982 = vmatmul.mubr.msk.bf16.vlgmr.msra.gmra.mxu1 %vm267_vm5, %v474_v49 }
 0x845   : > { %994 = vmatpush3.bf16.msra.mxu1 %v1133_v15  ;;  %997 = vmatprep.mubr.msk.bf16.mxu1 %vm1074_vm2, %v1073_v3 }
 0x846   : > { %995 = vmatprep.subr.bf16.mxu1 %v1073_v3 }
 0x849   : > { %996 = vmatpush3.bf16.msra.mxu1 %v1145_v19 }
 0x84a   : > { %1009 = vmatprep.subr.bf16.mxu1 %v1073_v3 }
 0x904   : > { %v512_v51 = vpop.f32.mrf.mxu1 }
 0x905   : > { %v518_v52 = vadd.f32 %v512_v51, %v232_v50 }
 0x906   : > { %v983_v53 = vpop.f32.mrf.mxu1 }
 0x907   : > { %v519_v55 = vmul.f32 %v518_v52, %v1172_v34  ;;  %v245_v53 = vadd.f32 %v1216_v22, %v1169_v29 }
 0x908   : > { %v515_v56 = vpop.f32.mrf.mxu1 }
 0x909   : > { %1045 = vtanh.f32 %v519_v55 }
 0x90a   : > { %v984_v57 = vpop.f32.mrf.mxu1 }
 0x916   : > { %v1046_v58 = vpop.eup %1045 }
 0x917   : > { %v521_v59 = vmul.f32 %v1046_v58, %v1172_v34 }
 0x919   : > { %v522_v60 = vadd.f32 %v521_v59, %v1176_v41 }
 0x91b   : > { %525 = vrot.lane.b32.xlu0 %v522_v60, %s1077_s27  ;;  %v523_v54 = vmul.f32 %v522_v60, %v464_v44 }
 0x98d   : > { %v526_v61 = vpop.permute.xlu0 %525 }
 0x98e   : > { %v528_v62 = vmul.f32 %v526_v61, %v522_v60 }
 0x990   : > { %530 = vrot.lane.b32.xlu1 %v528_v62, %s1077_s27 }
 0xa02   : > { %v531_v63 = vpop.permute.xlu1 %530 }
 0xa03   : > { %v533_v0 = vadd.f32 %v531_v63, %v523_v54 }
 0xa05   : > { %1047 = vtanh.f32 %v533_v0 }
 0xa12   : > { %v1048_v1 = vpop.eup %1047 }
 0xa13   : > { %536 = vrot.lane.b32.xlu0 %v1048_v1, %s1077_s27 }
 0xa85   : > { %v537_v2 = vpop.permute.xlu0 %536 }
 0xa86   : > { %v539_v4 = vmul.f32 %v537_v2, %v522_v60 }
 0xa88   : > { %v540_v5 = vpack.c.bf16 %v539_v4, %v539_v4 }
 0xa8a   : > { %542 = vrot.lane.b32.xlu1 %v540_v5, %s1078_s28 }
 0xafc   : > { %v543_v7 = vpop.permute.xlu1 %542 }
 0xafd   : > { %990 = vmatmul.mubr.msk.bf16.vlgmr.msra.gmra.mxu0 %vm267_vm5, %v543_v7 }
 0xafe   : > { %1002 = vmatpush3.bf16.msra.mxu0 %v1133_v15  ;;  %1005 = vmatprep.mubr.msk.bf16.mxu0 %vm1074_vm2, %v1073_v3 }
 0xaff   : > { %1003 = vmatprep.subr.bf16.mxu0 %v1073_v3 }
 0xb02   : > { %1004 = vmatpush3.bf16.msra.mxu0 %v1145_v19 }
 0xbbd   : > { %v581_v9 = vpop.f32.mrf.mxu0 }
 0xbbe   : > { %v587_v10 = vadd.f32 %v581_v9, %v237_v8 }
 0xbbf   : > { %v991_v11 = vpop.f32.mrf.mxu0 }
 0xbc0   : > { %v588_v12 = vmul.f32 %v587_v10, %v1172_v34  ;;  %v248_v10 = vadd.f32 %v1220_v24, %v1169_v29  ;;  %v818_v29 = vsub.s32 3, %v1163_v25 }
 0xbc1   : > { %v584_v13 = vpop.f32.mrf.mxu0 }
 0xbc2   : > { %1049 = vtanh.f32 %v588_v12  ;;  %v819_v24 = vrot.slane %v1122_v6, %v818_v29 }
 0xbc3   : > { %v992_v14 = vpop.f32.mrf.mxu0 }
 0xbcf   : > { %v1050_v16 = vpop.eup %1049 }
 0xbd0   : > { %v590_v17 = vmul.f32 %v1050_v16, %v1172_v34 }
 0xbd2   : > { %v591_v18 = vadd.f32 %v590_v17, %v1176_v41 }
 0xbd4   : > { %594 = vrot.lane.b32.xlu0 %v591_v18, %s1077_s27  ;;  %v592_v23 = vmul.f32 %v591_v18, %v533_v0 }
 0xc46   : > { %v595_v20 = vpop.permute.xlu0 %594 }
 0xc47   : > { %v597_v21 = vmul.f32 %v595_v20, %v591_v18 }
 0xc49   : > { %599 = vrot.lane.b32.xlu1 %v597_v21, %s1077_s27 }
 0xcbb   : > { %v600_v27 = vpop.permute.xlu1 %599 }
 0xcbc   : > { %v602_v30 = vadd.f32 %v600_v27, %v592_v23 }
 0xcbe   : > { %1051 = vtanh.f32 %v602_v30 }
 0xccb   : > { %v1052_v31 = vpop.eup %1051 }
 0xccc   : > { %605 = vrot.lane.b32.xlu0 %v1052_v31, %s1077_s27 }
 0xd3e   : > { %v606_v32 = vpop.permute.xlu0 %605 }
 0xd3f   : > { %v608_v33 = vmul.f32 %v606_v32, %v591_v18 }
 0xd41   : > { %v609_v35 = vpack.c.bf16 %v608_v33, %v608_v33 }
 0xd43   : > { %611 = vrot.lane.b32.xlu1 %v609_v35, %s1078_s28 }
 0xdb5   : > { %v612_v36 = vpop.permute.xlu1 %611 }
 0xdb6   : > { %998 = vmatmul.mubr.msk.bf16.vlgmr.msra.gmra.mxu1 %vm267_vm5, %v612_v36 }
 0xdb7   : > { %1010 = vmatpush3.bf16.msra.mxu1 %v1133_v15  ;;  %1013 = vmatprep.mubr.msk.bf16.mxu1 %vm1074_vm2, %v1073_v3 }
 0xdb8   : > { %1011 = vmatprep.subr.bf16.mxu1 %v1073_v3 }
 0xdbb   : > { %1012 = vmatpush3.bf16.msra.mxu1 %v1145_v19 }
 0xe76   : > { %v650_v38 = vpop.f32.mrf.mxu1 }
 0xe77   : > { %v656_v39 = vadd.f32 %v650_v38, %v240_v37 }
 0xe78   : > { %v999_v40 = vpop.f32.mrf.mxu1 }
 0xe79   : > { %v657_v42 = vmul.f32 %v656_v39, %v1172_v34 }
 0xe7a   : > { %v653_v28 = vpop.f32.mrf.mxu1 }
 0xe7b   : > { %1053 = vtanh.f32 %v657_v42 }
 0xe7c   : > { %v1000_v43 = vpop.f32.mrf.mxu1 }
 0xe88   : > { %v1054_v44 = vpop.eup %1053 }
 0xe89   : > { %v659_v15 = vmul.f32 %v1054_v44, %v1172_v34 }
 0xe8b   : > { %v660_v45 = vadd.f32 %v659_v15, %v1176_v41 }
 0xe8d   : > { %663 = vrot.lane.b32.xlu0 %v660_v45, %s1077_s27  ;;  %v661_v26 = vmul.f32 %v660_v45, %v602_v30 }
 0xeff   : > { %v664_v3 = vpop.permute.xlu0 %663 }
 0xf00   : > { %v666_v19 = vmul.f32 %v664_v3, %v660_v45 }
 0xf02   : > { %668 = vrot.lane.b32.xlu1 %v666_v19, %s1077_s27 }
 0xf74   : > { %v669_v46 = vpop.permute.xlu1 %668 }
 0xf75   : > { %v671_v47 = vadd.f32 %v669_v46, %v661_v26 }
 0xf77   : > { %1055 = vtanh.f32 %v671_v47 }
 0xf84   : > { %v1056_v48 = vpop.eup %1055 }
 0xf85   : > { %674 = vrot.lane.b32.xlu0 %v1056_v48, %s1077_s27 }
 0xff7   : > { %v675_v49 = vpop.permute.xlu0 %674 }
 0xff8   : > { %v677_v50 = vmul.f32 %v675_v49, %v660_v45 }
 0xffa   : > { %v678_v51 = vpack.c.bf16 %v677_v50, %v677_v50 }
 0xffc   : > { %680 = vrot.lane.b32.xlu1 %v678_v51, %s1078_s28 }
0x106e   : > { %v681_v52 = vpop.permute.xlu1 %680 }
0x106f   : > { %1006 = vmatmul.mubr.msk.bf16.vlgmr.msra.gmra.mxu0 %vm267_vm5, %v681_v52 }
0x112f   : > { %v719_v55 = vpop.f32.mrf.mxu0 }
0x1130   : > { %v725_v56 = vadd.f32 %v719_v55, %v245_v53 }
0x1131   : > { %v1007_v57 = vpop.f32.mrf.mxu0 }
0x1132   : > { %v726_v58 = vmul.f32 %v725_v56, %v1172_v34 }
0x1133   : > { %v722_v59 = vpop.f32.mrf.mxu0 }
0x1134   : > { %1057 = vtanh.f32 %v726_v58 }
0x1135   : > { %v1008_v60 = vpop.f32.mrf.mxu0 }
0x1141   : > { %v1058_v61 = vpop.eup %1057 }
0x1142   : > { %v728_v62 = vmul.f32 %v1058_v61, %v1172_v34 }
0x1144   : > { %v729_v54 = vadd.f32 %v728_v62, %v1176_v41 }
0x1146   : > { %732 = vrot.lane.b32.xlu0 %v729_v54, %s1077_s27  ;;  %v730_v22 = vmul.f32 %v729_v54, %v671_v47 }
0x11b8   : > { %v733_v63 = vpop.permute.xlu0 %732 }
0x11b9   : > { %v735_v0 = vmul.f32 %v733_v63, %v729_v54 }
0x11bb   : > { %737 = vrot.lane.b32.xlu1 %v735_v0, %s1077_s27 }
0x122d   : > { %v738_v1 = vpop.permute.xlu1 %737 }
0x122e   : > { %v740_v2 = vadd.f32 %v738_v1, %v730_v22 }
0x1230   : > { %1059 = vtanh.f32 %v740_v2 }
0x123d   : > { %v1060_v4 = vpop.eup %1059 }
0x123e   : > { %743 = vrot.lane.b32.xlu0 %v1060_v4, %s1077_s27 }
0x12b0   : > { %v744_v5 = vpop.permute.xlu0 %743 }
0x12b1   : > { %v746_v7 = vmul.f32 %v744_v5, %v729_v54 }
0x12b3   : > { %v747_v8 = vpack.c.bf16 %v746_v7, %v746_v7 }
0x12b5   : > { %749 = vrot.lane.b32.xlu1 %v747_v8, %s1078_s28 }
0x1327   : > { %v750_v9 = vpop.permute.xlu1 %749 }
0x1328   : > { %1014 = vmatmul.mubr.msk.bf16.vlgmr.msra.gmra.mxu1 %vm267_vm5, %v750_v9 }
0x13e8   : > { %v788_v11 = vpop.f32.mrf.mxu1 }
0x13e9   : > { %v794_v12 = vadd.f32 %v788_v11, %v248_v10 }
0x13ea   : > { %v1015_v13 = vpop.f32.mrf.mxu1 }
0x13eb   : > { %v795_v14 = vmul.f32 %v794_v12, %v1172_v34 }
0x13ec   : > { %v791_v16 = vpop.f32.mrf.mxu1 }
0x13ed   : > { %1061 = vtanh.f32 %v795_v14 }
0x13ee   : > { %v1016_v17 = vpop.f32.mrf.mxu1 }
0x13fa   : > { %v1062_v18 = vpop.eup %1061 }
0x13fb   : > { %v797_v20 = vmul.f32 %v1062_v18, %v1172_v34 }
0x13fd   : > { %v798_v21 = vadd.f32 %v797_v20, %v1176_v41 }
0x13ff   : > { %801 = vrot.lane.b32.xlu0 %v798_v21, %s1077_s27  ;;  %v799_v30 = vmul.f32 %v798_v21, %v740_v2 }
0x1471   : > { %v802_v23 = vpop.permute.xlu0 %801 }
0x1472   : > { %v804_v27 = vmul.f32 %v802_v23, %v798_v21 }
0x1474   : > { %806 = vrot.lane.b32.xlu1 %v804_v27, %s1077_s27 }
0x1478   : > { %821 = vrot.lane.b32.xlu1 %v819_v24, %s1078_s28 }
0x14e6   : > { %v807_v31 = vpop.permute.xlu1 %806 }
0x14e7   : > { %v809_v32 = vadd.f32 %v807_v31, %v799_v30 }
0x14e9   : > { %1063 = vtanh.f32 %v809_v32 }
0x14ea   : > { %v822_v33 = vpop.permute.xlu1 %821 }
0x14f6   : > { %v1064_v34 = vpop.eup %1063 }
0x14f7   : > { %812 = vrot.lane.b32.xlu0 %v1064_v34, %s1077_s27 }
0x1569   : > { %v813_v41 = vpop.permute.xlu0 %812 }
0x156a   : > { %v815_v35 = vmul.f32 %v813_v41, %v798_v21 }
0x156c   : > { %v824_v36 = vmul.f32 %v822_v33, %v815_v35 }
0x156e   : > { %826 = vrot.lane.b32.xlu0 %v824_v36, %s1078_s28 }
0x15e0   : > { %v827_v37 = vpop.permute.xlu0 %826 }
0x15e1   : > { %v829_v25 = vsel %vm267_vm5, %v827_v37, 0.0 }
0x15e2   : > { %830 = vadd.xlane.f32.xlu1 %v829_v25 }
0x166b   : > { %v831_v6 = vpop.xlane.xlu1 %830 }
0x166c   : > { %v832_v38 = vadd.f32 %v831_v6, %v819_v24 }
0x166e   : > { %834 = vrot.lane.b32.xlu0 %v832_v38, %s1079_s29 }
0x16e0   : > { %v835_v39 = vpop.permute.xlu0 %834 }
0x16e1   : > { %838 = vst.msk [vmem:[%s141_s5] sm:$0xff] %vm837_vm6, %v835_v39 }
0x16e2 PF: > { %s12_s9 = sadd.s32 1, %s1071_s9  }
0x16e3   : > { %p9_p4 = scmp.ge.s32.totalorder %s12_s9, 4  }
0x16e5   :  { %11 = sbr.rel (!%p9_p4) target bundleno = 1 (0x1), region = 58 }

</bundles_post_ra>
